<compile_context>
chip_gen: v7x
topology: tpu7x:2x2x1
jax: 0.10.0
libtpu: 0.0.40
codegen_flags: <defaults>
</compile_context>

<pallas_src>
import functools
import math

import jax
import jax.numpy as jnp
from jax import lax
from jax.experimental import pallas as pl
from jax.experimental.pallas import tpu as pltpu


def _attention_head_kernel(q_ref, k_ref, v_ref,
                           wq_ref, wk_ref, wv_ref,
                           bq_ref, bk_ref, bv_ref,
                           o_ref,
                           kproj_ref, vproj_ref,
                           *, inv_scale):
    """One (batch, query-tile) step of single-head attention.

    q_ref:  (TQ,  dim_in)   query rows for this tile (batch dim squeezed)
    k_ref:  (Skv, dim_in)   full key sequence for this batch element
    v_ref:  (Skv, dim_in)   full value sequence for this batch element
    w*_ref: (dim_in, dim_*) projection weights (grid-invariant, resident)
    b*_ref: (1, dim_*)      projection biases
    o_ref:  (TQ, dim_v)     output tile
    kproj_ref / vproj_ref:  VMEM scratch caching the K / V projections,
                            reused across query tiles of the same batch.
    """
    iq = pl.program_id(1)

    # Project K and V once per batch element; subsequent query tiles reuse them.
    @pl.when(iq == 0)
    def _():
        kproj_ref[...] = (
            jnp.dot(k_ref[...], wk_ref[...], preferred_element_type=jnp.float32)
            + bk_ref[...]
        )
        vproj_ref[...] = (
            jnp.dot(v_ref[...], wv_ref[...], preferred_element_type=jnp.float32)
            + bv_ref[...]
        )

    # Q projection for this query tile.
    qp = (jnp.dot(q_ref[...], wq_ref[...], preferred_element_type=jnp.float32)
          + bq_ref[...])

    # scores = Q @ K^T / sqrt(dim_k)  (contract dim_k, no explicit transpose).
    scores = lax.dot_general(
        qp, kproj_ref[...],
        (((1,), (1,)), ((), ())),
        preferred_element_type=jnp.float32) * inv_scale

    # Numerically stable softmax over the key axis.
    m = jnp.max(scores, axis=-1, keepdims=True)
    p = jnp.exp(scores - m)
    denom = jnp.sum(p, axis=-1, keepdims=True)

    out = jnp.dot(p, vproj_ref[...], preferred_element_type=jnp.float32)
    out = out * pl.reciprocal(denom, approx=False)

    o_ref[...] = out.astype(o_ref.dtype)


def attention_head_forward(query, key, value, wq, bq, wk, bk, wv, bv,
                           *, block_q=512):
    """query: (B, Sq, dim_in), key/value: (B, Skv, dim_in) -> (B, Sq, dim_v)."""
    B, Sq, dim_in = query.shape
    Bk, Skv, dim_in_k = key.shape
    assert (B, dim_in) == (Bk, dim_in_k)
    assert value.shape[:2] == (B, Skv)
    dim_k = wq.shape[1]
    dim_v = wv.shape[1]
    inv_scale = 1.0 / math.sqrt(dim_k)

    # Large query tile (amortizes per-step pipeline overhead); fall back to a
    # single tile when Sq does not divide evenly.
    tq = min(block_q, Sq)
    if Sq % tq != 0:
        tq = Sq  # TODO(synk): remainder/padded query tile for ragged Sq.

    bq2 = bq.reshape(1, dim_k)
    bk2 = bk.reshape(1, dim_k)
    bv2 = bv.reshape(1, dim_v)

    grid = (B, Sq // tq)

    # Explicit VMEM budget: resident weights + double-buffered activation
    # blocks + K/V projection scratch, with 2x headroom (f32 everywhere here).
    itemsize = 4
    est_bytes = (
        2 * tq * (dim_in + dim_v)            # double-buffered q-in / out tiles
        + 2 * 2 * Skv * dim_in               # double-buffered k and v tiles
        + dim_in * (2 * dim_k + dim_v)       # resident projection weights
        + (2 * dim_k + dim_v)                # biases
        + Skv * (dim_k + dim_v)              # K/V projection scratch
    ) * itemsize
    vmem_limit = int(max(32 * 1024 * 1024, 2 * est_bytes))

    kernel = functools.partial(_attention_head_kernel, inv_scale=inv_scale)

    return pl.pallas_call(
        kernel,
        out_shape=jax.ShapeDtypeStruct((B, Sq, dim_v), query.dtype),
        grid_spec=pltpu.PrefetchScalarGridSpec(
            num_scalar_prefetch=0,
            grid=grid,
            in_specs=[
                # activations: batch dim squeezed out of the kernel view
                pl.BlockSpec((None, tq, dim_in), lambda b, i: (b, i, 0)),   # query
                pl.BlockSpec((None, Skv, dim_in), lambda b, i: (b, 0, 0)),  # key
                pl.BlockSpec((None, Skv, dim_in), lambda b, i: (b, 0, 0)),  # value
                # grid-invariant parameters (resident, no per-step cast)
                pl.BlockSpec((dim_in, dim_k), lambda b, i: (0, 0)),         # Wq
                pl.BlockSpec((dim_in, dim_k), lambda b, i: (0, 0)),         # Wk
                pl.BlockSpec((dim_in, dim_v), lambda b, i: (0, 0)),         # Wv
                pl.BlockSpec((1, dim_k), lambda b, i: (0, 0)),              # bq
                pl.BlockSpec((1, dim_k), lambda b, i: (0, 0)),              # bk
                pl.BlockSpec((1, dim_v), lambda b, i: (0, 0)),              # bv
            ],
            out_specs=pl.BlockSpec((None, tq, dim_v), lambda b, i: (b, i, 0)),
            scratch_shapes=[
                pltpu.VMEM((Skv, dim_k), jnp.float32),   # cached K projection
                pltpu.VMEM((Skv, dim_v), jnp.float32),   # cached V projection
            ],
        ),
        compiler_params=pltpu.CompilerParams(
            # batch axis is independent (megacore-splittable on v7x);
            # query-tile axis carries the cached K/V projection -> arbitrary.
            dimension_semantics=("parallel", "arbitrary"),
            vmem_limit_bytes=vmem_limit,
        ),
    )(query, key, value, wq, wk, wv, bq2, bk2, bv2)


def reference_forward(query, key, value, wq, bq, wk, bk, wv, bv):
    """Pure-JAX reference of AttentionHead.forward."""
    Q = jnp.einsum("bsd,dk->bsk", query, wq) + bq
    K = jnp.einsum("bsd,dk->bsk", key, wk) + bk
    V = jnp.einsum("bsd,dv->bsv", value, wv) + bv
    scale = Q.shape[-1] ** 0.5
    scores = jnp.einsum("bqk,bsk->bqs", Q, K) / scale
    p = jax.nn.softmax(scores, axis=-1)
    return jnp.einsum("bqs,bsv->bqv", p, V)


if __name__ == "__main__":
    # Small demo shapes consistent with the module: batch=2, seq=8, hidden=32.
    B, S, DIM_IN, DIM_K, DIM_V = 2, 8, 32, 32, 32

    key0 = jax.random.PRNGKey(0)
    (kq, kk, kv, kwq, kwk, kwv, kbq, kbk, kbv) = jax.random.split(key0, 9)

    query = jax.random.normal(kq, (B, S, DIM_IN), dtype=jnp.float32)
    key_ = jax.random.normal(kk, (B, S, DIM_IN), dtype=jnp.float32)
    value = jax.random.normal(kv, (B, S, DIM_IN), dtype=jnp.float32)

    # Deterministic Linear-style init; weights stored (dim_in, dim_out) so the
    # kernel computes x @ W + b (== torch x @ weight.T).
    def _w(k, din, dout):
        return jax.random.normal(k, (din, dout), jnp.float32) * (1.0 / math.sqrt(din))

    wq = _w(kwq, DIM_IN, DIM_K)
    wk = _w(kwk, DIM_IN, DIM_K)
    wv = _w(kwv, DIM_IN, DIM_V)
    bq = 0.02 * jax.random.normal(kbq, (DIM_K,), jnp.float32)
    bk = 0.02 * jax.random.normal(kbk, (DIM_K,), jnp.float32)
    bv = 0.02 * jax.random.normal(kbv, (DIM_V,), jnp.float32)

    out = attention_head_forward(query, key_, value, wq, bq, wk, bk, wv, bv)
    out = jax.block_until_ready(out)

    ref = reference_forward(query, key_, value, wq, bq, wk, bk, wv, bv)
    assert out.shape == (B, S, DIM_V)
    # Slightly relaxed tolerance: three chained MXU matmuls + softmax vs the
    # XLA einsum reference.
    assert jnp.allclose(out, ref, atol=1e-3, rtol=1e-3), "mismatch vs reference"

    print("KERNEL_OK")
</pallas_src>

<mosaic_0001>
module attributes {stable_mosaic.version = 11 : i64} {
  func.func @_attention_head_kernel(%arg0: i32, %arg1: i32, %arg2: memref<1x8x32xf32, #tpu.memory_space<vmem>>, %arg3: memref<1x8x32xf32, #tpu.memory_space<vmem>>, %arg4: memref<1x8x32xf32, #tpu.memory_space<vmem>>, %arg5: memref<32x32xf32, #tpu.memory_space<vmem>>, %arg6: memref<32x32xf32, #tpu.memory_space<vmem>>, %arg7: memref<32x32xf32, #tpu.memory_space<vmem>>, %arg8: memref<1x32xf32, #tpu.memory_space<vmem>>, %arg9: memref<1x32xf32, #tpu.memory_space<vmem>>, %arg10: memref<1x32xf32, #tpu.memory_space<vmem>>, %arg11: memref<1x8x32xf32, #tpu.memory_space<vmem>>, %arg12: memref<8x32xf32, #tpu.memory_space<vmem>>, %arg13: memref<8x32xf32, #tpu.memory_space<vmem>>) attributes {dimension_semantics = [#tpu.dimension_semantics<parallel>, #tpu.dimension_semantics<arbitrary>], iteration_bounds = array<i64: 2, 1>, scalar_prefetch = 0 : i64, scratch_operands = 2 : i64, tpu.core_type = #tpu.core_type<tc>, window_params = [{transform_indices = @transform_0, window_bounds = array<i64: 1, 8, 32>}, {transform_indices = @transform_1, window_bounds = array<i64: 1, 8, 32>}, {transform_indices = @transform_2, window_bounds = array<i64: 1, 8, 32>}, {pipeline_mode = #tpu.pipeline_mode<synchronous>, transform_indices = @transform_3, window_bounds = array<i64: 32, 32>}, {pipeline_mode = #tpu.pipeline_mode<synchronous>, transform_indices = @transform_4, window_bounds = array<i64: 32, 32>}, {pipeline_mode = #tpu.pipeline_mode<synchronous>, transform_indices = @transform_5, window_bounds = array<i64: 32, 32>}, {pipeline_mode = #tpu.pipeline_mode<synchronous>, transform_indices = @transform_6, window_bounds = array<i64: 1, 32>}, {pipeline_mode = #tpu.pipeline_mode<synchronous>, transform_indices = @transform_7, window_bounds = array<i64: 1, 32>}, {pipeline_mode = #tpu.pipeline_mode<synchronous>, transform_indices = @transform_8, window_bounds = array<i64: 1, 32>}, {transform_indices = @transform_9, window_bounds = array<i64: 1, 8, 32>}]} {
    %c0_i32 = arith.constant 0 : i32
    %0 = arith.cmpi eq, %arg1, %c0_i32 : i32
    %1 = arith.extui %0 : i1 to i32
    %c0_i32_0 = arith.constant 0 : i32
    %2 = arith.cmpi ne, %1, %c0_i32_0 : i32
    scf.if %2 {
      %c0_19 = arith.constant 0 : index
      %c0_20 = arith.constant 0 : index
      %c0_21 = arith.constant 0 : index
      %29 = vector.load %arg3[%c0_19, %c0_20, %c0_21] : memref<1x8x32xf32, #tpu.memory_space<vmem>>, vector<1x8x32xf32>
      %30 = vector.shape_cast %29 : vector<1x8x32xf32> to vector<8x32xf32>
      %c0_22 = arith.constant 0 : index
      %c0_23 = arith.constant 0 : index
      %31 = vector.load %arg6[%c0_22, %c0_23] : memref<32x32xf32, #tpu.memory_space<vmem>>, vector<32x32xf32>
      %cst_24 = arith.constant dense<0.000000e+00> : vector<8x32xf32>
      %32 = tpu.matmul %30, %31, %cst_24 {dimension_numbers = #tpu.dot_dimension_numbers<[1], [0], [0], [1], [0, 0, 1, 1], [], []>} : vector<8x32xf32>, vector<32x32xf32>, vector<8x32xf32> -> vector<8x32xf32>
      %c0_25 = arith.constant 0 : index
      %c0_26 = arith.constant 0 : index
      %33 = vector.load %arg9[%c0_25, %c0_26] : memref<1x32xf32, #tpu.memory_space<vmem>>, vector<1x32xf32>
      %34 = vector.broadcast %33 : vector<1x32xf32> to vector<8x32xf32>
      %35 = arith.addf %32, %34 : vector<8x32xf32>
      %c0_27 = arith.constant 0 : index
      %c0_28 = arith.constant 0 : index
      %36 = vector.load %arg12[%c0_27, %c0_28] : memref<8x32xf32, #tpu.memory_space<vmem>>, vector<8x32xf32>
      tpu.vector_store %arg12[%c0_27, %c0_28], %35 {strides = array<i32>} : memref<8x32xf32, #tpu.memory_space<vmem>>, vector<8x32xf32>,
      %c0_29 = arith.constant 0 : index
      %c0_30 = arith.constant 0 : index
      %c0_31 = arith.constant 0 : index
      %37 = vector.load %arg4[%c0_29, %c0_30, %c0_31] : memref<1x8x32xf32, #tpu.memory_space<vmem>>, vector<1x8x32xf32>
      %38 = vector.shape_cast %37 : vector<1x8x32xf32> to vector<8x32xf32>
      %c0_32 = arith.constant 0 : index
      %c0_33 = arith.constant 0 : index
      %39 = vector.load %arg7[%c0_32, %c0_33] : memref<32x32xf32, #tpu.memory_space<vmem>>, vector<32x32xf32>
      %cst_34 = arith.constant dense<0.000000e+00> : vector<8x32xf32>
      %40 = tpu.matmul %38, %39, %cst_34 {dimension_numbers = #tpu.dot_dimension_numbers<[1], [0], [0], [1], [0, 0, 1, 1], [], []>} : vector<8x32xf32>, vector<32x32xf32>, vector<8x32xf32> -> vector<8x32xf32>
      %c0_35 = arith.constant 0 : index
      %c0_36 = arith.constant 0 : index
      %41 = vector.load %arg10[%c0_35, %c0_36] : memref<1x32xf32, #tpu.memory_space<vmem>>, vector<1x32xf32>
      %42 = vector.broadcast %41 : vector<1x32xf32> to vector<8x32xf32>
      %43 = arith.addf %40, %42 : vector<8x32xf32>
      %c0_37 = arith.constant 0 : index
      %c0_38 = arith.constant 0 : index
      %44 = vector.load %arg13[%c0_37, %c0_38] : memref<8x32xf32, #tpu.memory_space<vmem>>, vector<8x32xf32>
      tpu.vector_store %arg13[%c0_37, %c0_38], %43 {strides = array<i32>} : memref<8x32xf32, #tpu.memory_space<vmem>>, vector<8x32xf32>,
    } else {
    }
    %c0 = arith.constant 0 : index
    %c0_1 = arith.constant 0 : index
    %c0_2 = arith.constant 0 : index
    %3 = vector.load %arg2[%c0, %c0_1, %c0_2] : memref<1x8x32xf32, #tpu.memory_space<vmem>>, vector<1x8x32xf32>
    %4 = vector.shape_cast %3 : vector<1x8x32xf32> to vector<8x32xf32>
    %c0_3 = arith.constant 0 : index
    %c0_4 = arith.constant 0 : index
    %5 = vector.load %arg5[%c0_3, %c0_4] : memref<32x32xf32, #tpu.memory_space<vmem>>, vector<32x32xf32>
    %cst = arith.constant dense<0.000000e+00> : vector<8x32xf32>
    %6 = tpu.matmul %4, %5, %cst {dimension_numbers = #tpu.dot_dimension_numbers<[1], [0], [0], [1], [0, 0, 1, 1], [], []>} : vector<8x32xf32>, vector<32x32xf32>, vector<8x32xf32> -> vector<8x32xf32>
    %c0_5 = arith.constant 0 : index
    %c0_6 = arith.constant 0 : index
    %7 = vector.load %arg8[%c0_5, %c0_6] : memref<1x32xf32, #tpu.memory_space<vmem>>, vector<1x32xf32>
    %8 = vector.broadcast %7 : vector<1x32xf32> to vector<8x32xf32>
    %9 = arith.addf %6, %8 : vector<8x32xf32>
    %c0_7 = arith.constant 0 : index
    %c0_8 = arith.constant 0 : index
    %10 = vector.load %arg12[%c0_7, %c0_8] : memref<8x32xf32, #tpu.memory_space<vmem>>, vector<8x32xf32>
    %cst_9 = arith.constant dense<0.000000e+00> : vector<8x8xf32>
    %11 = tpu.matmul %9, %10, %cst_9 {dimension_numbers = #tpu.dot_dimension_numbers<[1], [1], [0], [0], [0, 0, 1, 0], [], []>} : vector<8x32xf32>, vector<8x32xf32>, vector<8x8xf32> -> vector<8x8xf32>
    %cst_10 = arith.constant 0.176776692 : f32
    %12 = vector.broadcast %cst_10 : f32 to vector<8x8xf32>
    %13 = arith.mulf %11, %12 : vector<8x8xf32>
    %cst_11 = arith.constant dense<0xFF800000> : vector<8xf32>
    %14 = vector.multi_reduction <maximumf>, %13, %cst_11 [1] : vector<8x8xf32> to vector<8xf32>
    %15 = vector.shape_cast %14 : vector<8xf32> to vector<8x1xf32>
    %16 = vector.broadcast %15 : vector<8x1xf32> to vector<8x8xf32>
    %17 = arith.subf %13, %16 : vector<8x8xf32>
    %18 = math.exp %17 : vector<8x8xf32>
    %cst_12 = arith.constant dense<0.000000e+00> : vector<8xf32>
    %19 = vector.multi_reduction <add>, %18, %cst_12 [1] : vector<8x8xf32> to vector<8xf32>
    %20 = vector.shape_cast %19 : vector<8xf32> to vector<8x1xf32>
    %c0_13 = arith.constant 0 : index
    %c0_14 = arith.constant 0 : index
    %21 = vector.load %arg13[%c0_13, %c0_14] : memref<8x32xf32, #tpu.memory_space<vmem>>, vector<8x32xf32>
    %cst_15 = arith.constant dense<0.000000e+00> : vector<8x32xf32>
    %22 = tpu.matmul %18, %21, %cst_15 {dimension_numbers = #tpu.dot_dimension_numbers<[1], [0], [0], [1], [0, 0, 1, 1], [], []>} : vector<8x8xf32>, vector<8x32xf32>, vector<8x32xf32> -> vector<8x32xf32>
    %23 = tpu.reciprocal %20 : vector<8x1xf32> -> vector<8x1xf32>
    %24 = vector.broadcast %23 : vector<8x1xf32> to vector<8x32xf32>
    %25 = arith.mulf %22, %24 : vector<8x32xf32>
    %c0_16 = arith.constant 0 : index
    %c0_17 = arith.constant 0 : index
    %c0_18 = arith.constant 0 : index
    %26 = vector.load %arg11[%c0_16, %c0_17, %c0_18] : memref<1x8x32xf32, #tpu.memory_space<vmem>>, vector<1x8x32xf32>
    %27 = vector.shape_cast %26 : vector<1x8x32xf32> to vector<8x32xf32>
    %28 = vector.shape_cast %25 : vector<8x32xf32> to vector<1x8x32xf32>
    tpu.vector_store %arg11[%c0_16, %c0_17, %c0_18], %28 {strides = array<i32>} : memref<1x8x32xf32, #tpu.memory_space<vmem>>, vector<1x8x32xf32>,
    return
  }
  func.func @transform_0(%arg0: i32, %arg1: i32) -> (i32, i32, i32) {
    %c0_i32 = arith.constant 0 : i32
    %c0_i32_0 = arith.constant 0 : i32
    return %arg0, %arg1, %c0_i32 : i32, i32, i32
  }
  func.func @transform_1(%arg0: i32, %arg1: i32) -> (i32, i32, i32) {
    %c0_i32 = arith.constant 0 : i32
    %c0_i32_0 = arith.constant 0 : i32
    %c0_i32_1 = arith.constant 0 : i32
    return %arg0, %c0_i32, %c0_i32_0 : i32, i32, i32
  }
  func.func @transform_2(%arg0: i32, %arg1: i32) -> (i32, i32, i32) {
    %c0_i32 = arith.constant 0 : i32
    %c0_i32_0 = arith.constant 0 : i32
    %c0_i32_1 = arith.constant 0 : i32
    return %arg0, %c0_i32, %c0_i32_0 : i32, i32, i32
  }
  func.func @transform_3(%arg0: i32, %arg1: i32) -> (i32, i32) {
    %c0_i32 = arith.constant 0 : i32
    %c0_i32_0 = arith.constant 0 : i32
    %c0_i32_1 = arith.constant 0 : i32
    return %c0_i32, %c0_i32_0 : i32, i32
  }
  func.func @transform_4(%arg0: i32, %arg1: i32) -> (i32, i32) {
    %c0_i32 = arith.constant 0 : i32
    %c0_i32_0 = arith.constant 0 : i32
    %c0_i32_1 = arith.constant 0 : i32
    return %c0_i32, %c0_i32_0 : i32, i32
  }
  func.func @transform_5(%arg0: i32, %arg1: i32) -> (i32, i32) {
    %c0_i32 = arith.constant 0 : i32
    %c0_i32_0 = arith.constant 0 : i32
    %c0_i32_1 = arith.constant 0 : i32
    return %c0_i32, %c0_i32_0 : i32, i32
  }
  func.func @transform_6(%arg0: i32, %arg1: i32) -> (i32, i32) {
    %c0_i32 = arith.constant 0 : i32
    %c0_i32_0 = arith.constant 0 : i32
    %c0_i32_1 = arith.constant 0 : i32
    return %c0_i32, %c0_i32_0 : i32, i32
  }
  func.func @transform_7(%arg0: i32, %arg1: i32) -> (i32, i32) {
    %c0_i32 = arith.constant 0 : i32
    %c0_i32_0 = arith.constant 0 : i32
    %c0_i32_1 = arith.constant 0 : i32
    return %c0_i32, %c0_i32_0 : i32, i32
  }
  func.func @transform_8(%arg0: i32, %arg1: i32) -> (i32, i32) {
    %c0_i32 = arith.constant 0 : i32
    %c0_i32_0 = arith.constant 0 : i32
    %c0_i32_1 = arith.constant 0 : i32
    return %c0_i32, %c0_i32_0 : i32, i32
  }
  func.func @transform_9(%arg0: i32, %arg1: i32) -> (i32, i32, i32) {
    %c0_i32 = arith.constant 0 : i32
    %c0_i32_0 = arith.constant 0 : i32
    return %arg0, %arg1, %c0_i32 : i32, i32, i32
  }
}

</mosaic_0001>

<bundles_post_ra>
// kernel: tpu_custom_call.1
= control target key start
LH: loop header
LB: loop body
LE: loop exit
PB: predicated region body
PF: predicated region fallthrough
CT: control target
= control target key end

     0   :  { %s1999_s0 = inlined_call_operand.hbm [shape: f32[2,8,32], index: 0, kind: input, shape index: {}]   ;;  %s2000_s1 = inlined_call_operand.hbm [shape: f32[2,8,32], index: 1, kind: input, shape index: {}]   ;;  %s2001_s2 = inlined_call_operand.hbm [shape: f32[2,8,32], index: 2, kind: input, shape index: {}]   ;;  %s2002_s3 = inlined_call_operand.hbm [shape: f32[32,32], index: 3, kind: input, shape index: {}]   ;;  %s2003_s4 = inlined_call_operand.hbm [shape: f32[32,32], index: 4, kind: input, shape index: {}]   ;;  %s2004_s5 = inlined_call_operand.hbm [shape: f32[32,32], index: 5, kind: input, shape index: {}]   ;;  %s2005_s6 = inlined_call_operand.vmem [shape: f32[1,32], index: 6, kind: input, shape index: {}]   ;;  %s2006_s7 = inlined_call_operand.vmem [shape: f32[1,32], index: 7, kind: input, shape index: {}]   ;;  %s2007_s8 = inlined_call_operand.vmem [shape: f32[1,32], index: 8, kind: input, shape index: {}]   ;;  %s2008_s9 = inlined_call_operand.hbm [shape: f32[2,8,32], index: 9, kind: output, shape index: {}]  }
   0x1   :  { %2035 = sst [smem:[#allocation29_spill]] %s2000_s1 }
   0x2   :  { %2036 = sst [smem:[#allocation30_spill]] %s2002_s3 }
   0x3   :  { %2037 = sst [smem:[#allocation31_spill]] %s2005_s6 }
   0x4   :  { %2038 = sst [smem:[#allocation32_spill]] %s2007_s8 }
   0x5   :  { %2039 = sst [smem:[#allocation33_spill]] %s2008_s9 }
   0x6   :  { %14 = vsyncpa [#allocation5], 0 }
   0x7   :  { %16 = vsyncpa [#allocation5 + $0x1], 0 }
   0x8   :  { %17 = vsyncpa [#allocation8], 0 }
   0x9   :  { %19 = vsyncpa [#allocation8 + $0x1], 0 }
   0xa   :  { %20 = vsyncpa [#allocation11], 0 }
   0xb   :  { %21 = vsyncpa [#allocation14], 0 }
   0xc   :  { %22 = vsyncpa [#allocation6], 0 }
   0xd   :  { %24 = vsyncpa [#allocation6 + $0x1], 0  ;;  %s1633_s30 = smov 0   ;;  %s1635_s10 = smov 0  }
   0xe   :  { %s1637_s11 = smov 0   ;;  %s1639_s12 = smov 0  }
   0xf   :  { %s1641_s13 = smov 0   ;;  %s1643_s14 = smov 0  }
  0x10 LB: > { %2040 = sst [smem:[#allocation21_spill]] %s1549_s30  ;;  %s1664_s15 = sadd.s32 4294967295, %s1569_s14   ;;  %s1569_s14 = sphi %s1643_s14, %s30_s14   ;;  %s1565_s13 = sphi %s1641_s13, %s2086_s13   ;;  %s1561_s12 = sphi %s1639_s12, %s2085_s12   ;;  %s1557_s11 = sphi %s1637_s11, %s2089_s11   ;;  %s1553_s10 = sphi %s1635_s10, %s2088_s10   ;;  %s1549_s30 = sphi %s1633_s30, %s2087_s30  }
  0x11   : > { %2041 = sst [smem:[#allocation22_spill]] %s1561_s12  ;;  %s1076_s16 = sadd.s32 4294967294, %s1569_s14  }
  0x12   : > { %2042 = sst [smem:[#allocation23_spill]] %s1565_s13  ;;  %p64_p0 = scmp.ne.s32.totalorder %s1553_s10, %s1549_s30 }
  0x13   : > { %2043 = sst [smem:[#allocation24_spill]] %s1569_s14  ;;  %p2009_p1 = scmp.eq.s32.totalorder %s1664_s15, 0 }
  0x14   : > { %p274_p3 = scmp.eq.s32.totalorder %s1076_s16, 1  ;;  %p1077_p5 = scmp.ge.s32.totalorder %s1569_s14, 1 }
  0x15   : > { %p1673_p4 = por %p2009_p1, %p64_p0  ;;  %p281_p7 = scmp.lt.s32.totalorder %s1569_s14, 3 }
  0x16   : > { %p1678_p6 = por %p274_p3, %p64_p0  ;;  %s1571_s20 = smov [#allocation10]  }
  0x17   : > { %s2044_s17 = scalar_select %p1673_p4, 1, 0 }
  0x18   : > { %s2045_s18 = scalar_select %p1678_p6, 1, 0 }
  0x19   : > { %p1683_p8 = pnand %p1077_p5, %p281_p7  ;;  %s293_s21 = sshll.u32 %s1571_s20, 4  ;;  %s294_s21 = int_to_ptr.vmem [resolvable:$true] %s293_s21 }
  0x1a   : > { %2046 = sst [smem:[#allocation25_spill]] %s2045_s18  ;;  %s42_s23 = sadd.s32 1, %s1565_s13 }
  0x1b   : > { %s2047_s19 = scalar_select %p1683_p8, 1, 0 }
  0x1c   : > { %p1209_p9 = pneg %p1683_p8  ;;  %s2049_s3 = sld [smem:[#allocation30_spill]] }
  0x1e   : > { %p1692_p11 = pnand %p1209_p9, %p2009_p1 }
  0x20   : > { %s2048_s22 = scalar_select %p1692_p11, 1, 0 }
  0x21   : > { %p1705_p13 = pneg %p1692_p11 }
  0x22   : > { %s1301_s26 = scalar_lea.hbm %s2049_s3, 512 }
  0x23   : > { %p1302_p12 = scmp.ne.s32.totalorder %s2049_s3, %s1301_s26  ;;  %p1308_p5 = scmp.lt.u32.totalorder %s1301_s26, %s2049_s3 }
  0x24   : > { %s2050_s29 = scalar_select %p1705_p13, 1, 0 }
  0x25   : > { %p1304_p0 = pnand %p1705_p13, %p1302_p12 }
  0x27   : > { %p1305_p3 = pneg %p1304_p0 }
  0x29   : > { %p1310_p7 = pnand %p1308_p5, %p1305_p3 }
  0x2b   : > { %1313 = shalt.err (!%p1310_p7)
}
  0x2c   : > { %s1314_s24 = scalar_lea.vmem %s294_s21, 512  ;;  %p1322_p2 = scmp.lt.s32.totalorder %s294_s21, %s294_s21 }
  0x2d   : > { %p1315_p9 = scmp.ne.s32.totalorder %s294_s21, %s1314_s24  ;;  %p1323_p6 = scmp.lt.s32.totalorder %s1314_s24, %s1314_s24 }
  0x2f   : > { %p1317_p10 = pnand %p1315_p9, %p1705_p13  ;;  %p1324_p4 = por %p1323_p6, %p1322_p2 }
  0x31   : > { %p1318_p1 = pneg %p1317_p10 }
  0x33   : > { %p1325_p8 = pnand %p1324_p4, %p1318_p1 }
  0x35   : > { %1328 = shalt.err (!%p1325_p8)
}
  0x36   : > { %s2013_s25 = smov 128   ;;  %s2015_s26 = smov 8  }
  0x37   : > { %1212 = dma.hbm_to_vmem [thread:$0]  (!%p1692_p11), %s2049_s3, 512, %s294_s21, [#allocation11], %s2013_s25, %s2013_s25, %s2015_s26  }
  0x38   : > { %p44_p1 = scmp.ge.s32.totalorder %s42_s23, 2  ;;  %s51_s16 = sadd.s32 1, %s1557_s11 }
  0x39   : > { %p58_p2 = scmp.ne.s32.totalorder %s1557_s11, %s1553_s10  ;;  %p59_p4 = scmp.eq.s32.totalorder %s1569_s14, 0 }
  0x3a   : > { %s2091_s23 = smov (%p44_p1, %s42_s23), 0  ;;  %p2052_p8 = scmp.eq.s32.totalorder %s1664_s15, 1 }
  0x3b   : > { %2051 = sst [smem:[#allocation26_spill]] %s2091_s23  ;;  %p60_p6 = por %p59_p4, %p58_p2 }
  0x3c   : > { %p1732_p10 = por %p2052_p8, %p58_p2  ;;  %s46_s24 = ssub.s32 %s1565_s13, %s2091_s23 }
  0x3d   : > { %p1236_p12 = scmp.lt.s32.totalorder %s1569_s14, 2  ;;  %p49_p0 = scmp.eq.s32.totalorder %s46_s24, 0 }
  0x3e   : > { %s2053_s20 = scalar_select %p1732_p10, 1, 0 }
  0x3f   : > { %s2018_s18 = sand.u32 1, %s1557_s11   ;;  %s1745_s27 = sshll.u32 %s1565_s13, 7 }
  0x40   : > { %2054 = sst [smem:[#allocation27_spill]] %s2053_s20  ;;  %s1742_s21 = sshll.u32 %s2018_s18, 3 }
  0x41   : > { %s1748_s28 = scalar_select %p49_p0, %s1557_s11, %s51_s16  }
  0x42   : > { %p1750_p3 = pnand %p1236_p12, %p60_p6  ;;  %s361_s26 = sand.u32 1, %s1569_s14  }
  0x43   : > { %2055 = sst [smem:[#allocation28_spill]] %s1748_s28  ;;  %s2057_s1 = sld [smem:[#allocation29_spill]] }
  0x44   : > { %s2056_s25 = scalar_select %p1750_p3, 1, 0 }
  0x45   : > { %s365_s18 = scalar_lea.vmem [#allocation7], %s1742_s21  ;;  %s1574_s16 = smov [#allocation12]  }
  0x46   : > { %s372_s13 = sshll.u32 %s365_s18, 4  ;;  %s1764_s28 = sshll.u32 %s1574_s16, 4  ;;  %s1762_s13 = int_to_ptr.vmem [resolvable:$true] %s372_s13  ;;  %s307_s28 = int_to_ptr.vmem [resolvable:$true] %s1764_s28 }
  0x47   : > { %s1766_s30 = scalar_lea.sflag [#allocation8], %s361_s26  ;;  %p1772_p7 = pneg %p1750_p3 }
  0x49   : > { %s1759_s24 = scalar_lea.hbm %s2057_s1, %s1745_s27  ;;  %s1334_s14 = scalar_lea.hbm %s2057_s1, 256 }
  0x4a   : > { %s1329_s9 = scalar_lea.hbm %s1759_s24, 128  ;;  %p1335_p2 = scmp.lt.u32.totalorder %s1759_s24, %s2057_s1 }
  0x4b   : > { %p1330_p5 = scmp.ne.s32.totalorder %s1759_s24, %s1329_s9  ;;  %p1336_p4 = scmp.lt.u32.totalorder %s1334_s14, %s1329_s9 }
  0x4c   : > { %s2058_s3 = scalar_select %p1772_p7, 1, 0 }
  0x4d   : > { %p1332_p9 = pnand %p1772_p7, %p1330_p5  ;;  %p1337_p6 = por %p1336_p4, %p1335_p2 }
  0x4e   : > { %p1338_p8 = scmp.lt.u32.totalorder %s1329_s9, %s1759_s24 }
  0x4f   : > { %p1333_p1 = pneg %p1332_p9 }
  0x50   : > { %p1339_p12 = por %p1338_p8, %p1337_p6 }
  0x52   : > { %p1340_p0 = pnand %p1339_p12, %p1333_p1 }
  0x54   : > { %1343 = shalt.err (!%p1340_p0)
}
  0x55   : > { %s1344_s26 = scalar_lea.vmem %s1762_s13, 128  ;;  %s1575_s23 = smov [#allocation7]  }
  0x56   : > { %p1345_p5 = scmp.ne.s32.totalorder %s1762_s13, %s1344_s26  ;;  %s1349_s18 = sshll.u32 %s1575_s23, 4  ;;  %s1350_s18 = int_to_ptr.vmem [resolvable:$false] %s1349_s18 }
  0x57   : > { %s1351_s20 = scalar_lea.vmem %s1350_s18, 256  ;;  %p1352_p11 = scmp.lt.s32.totalorder %s1762_s13, %s1350_s18 }
  0x58   : > { %p1347_p9 = pnand %p1345_p5, %p1772_p7  ;;  %p1353_p13 = scmp.lt.s32.totalorder %s1351_s20, %s1344_s26 }
  0x5a   : > { %p1348_p10 = pneg %p1347_p9  ;;  %p1354_p2 = por %p1353_p13, %p1352_p11 }
  0x5c   : > { %p1355_p4 = pnand %p1354_p2, %p1348_p10 }
  0x5e   : > { %1358 = shalt.err (!%p1355_p4)
}
  0x5f   : > { %1225 = dma.hbm_to_vmem [thread:$0]  (!%p1750_p3), %s1759_s24, 128, %s1762_s13, %s1766_s30  }
  0x60   : > { %s1359_s16 = scalar_lea.hbm %s2003_s4, 512  ;;  %p2059_p11 = scmp.ne.s32.totalorder %s2050_s29, 0 }
  0x61   : > { %p1360_p1 = scmp.ne.s32.totalorder %s2003_s4, %s1359_s16  ;;  %p1366_p6 = scmp.lt.u32.totalorder %s1359_s16, %s2003_s4 }
  0x63   : > { %p1362_p13 = pnand %p1360_p1, %p2059_p11 }
  0x65   : > { %p1363_p10 = pneg %p1362_p13 }
  0x67   : > { %p1368_p8 = pnand %p1366_p6, %p1363_p10 }
  0x69   : > { %1371 = shalt.err (!%p1368_p8)
}
  0x6a   : > { %s1372_s20 = scalar_lea.vmem %s307_s28, 512  ;;  %p1380_p9 = scmp.lt.s32.totalorder %s307_s28, %s307_s28 }
  0x6b   : > { %p1373_p12 = scmp.ne.s32.totalorder %s307_s28, %s1372_s20  ;;  %p1381_p2 = scmp.lt.s32.totalorder %s1372_s20, %s1372_s20 }
  0x6d   : > { %p1375_p0 = pnand %p1373_p12, %p2059_p11  ;;  %p1382_p4 = por %p1381_p2, %p1380_p9 }
  0x6f   : > { %p1376_p5 = pneg %p1375_p0 }
  0x71   : > { %p1383_p3 = pnand %p1382_p4, %p1376_p5 }
  0x73   : > { %1386 = shalt.err (!%p1383_p3)
}
  0x74   : > { %p2060_p1 = scmp.ne.s32.totalorder %s2048_s22, 0  ;;  %s2061_s1 = smov 8  }
  0x75   : > { %s2062_s13 = smov 128   ;;  %s1576_s14 = smov [#allocation13]  }
  0x76   : > { %1215 = dma.hbm_to_vmem [thread:$0]  (!%p2060_p1), %s2003_s4, 512, %s307_s28, [#allocation11], %s2062_s13, %s2062_s13, %s2061_s1  }
  0x77   : > { %s319_s16 = sshll.u32 %s1576_s14, 4  ;;  %s1387_s18 = scalar_lea.hbm %s2004_s5, 512  ;;  %s320_s16 = int_to_ptr.vmem [resolvable:$true] %s319_s16 }
  0x78   : > { %p1388_p3 = scmp.ne.s32.totalorder %s2004_s5, %s1387_s18  ;;  %p1394_p6 = scmp.lt.u32.totalorder %s1387_s18, %s2004_s5 }
  0x7a   : > { %p1390_p13 = pnand %p1388_p3, %p2059_p11 }
  0x7c   : > { %p1391_p10 = pneg %p1390_p13 }
  0x7e   : > { %p1396_p8 = pnand %p1394_p6, %p1391_p10 }
  0x80   : > { %1399 = shalt.err (!%p1396_p8)
}
  0x81   : > { %s1400_s28 = scalar_lea.vmem %s320_s16, 512  ;;  %p1408_p9 = scmp.lt.s32.totalorder %s320_s16, %s320_s16 }
  0x82   : > { %p1401_p12 = scmp.ne.s32.totalorder %s320_s16, %s1400_s28  ;;  %p1409_p2 = scmp.lt.s32.totalorder %s1400_s28, %s1400_s28 }
  0x84   : > { %p1403_p0 = pnand %p1401_p12, %p2059_p11  ;;  %p1410_p4 = por %p1409_p2, %p1408_p9 }
  0x86   : > { %p1404_p5 = pneg %p1403_p0 }
  0x88   : > { %p1411_p7 = pnand %p1410_p4, %p1404_p5 }
  0x8a   : > { %1414 = shalt.err (!%p1411_p7)
}
  0x8b   : > { %1218 = dma.hbm_to_vmem [thread:$0]  (!%p2060_p1), %s2004_s5, 512, %s320_s16, [#allocation14], %s2062_s13, %s2062_s13, %s2061_s1  }
  0x8c   : > { %s1843_s24 = scalar_lea.hbm %s1999_s0, %s1745_s27  ;;  %s346_s22 = scalar_lea.vmem [#allocation4], %s1742_s21 }
  0x8d   : > { %s354_s9 = sshll.u32 %s346_s22, 4  ;;  %s2063_s14 = sand.u32 1, %s1557_s11   ;;  %s355_s9 = int_to_ptr.vmem [resolvable:$true] %s354_s9 }
  0x8e   : > { %s343_s23 = scalar_lea.sflag [#allocation5], %s2063_s14  ;;  %s1415_s26 = scalar_lea.hbm %s1843_s24, 128 }
  0x8f   : > { %p1416_p7 = scmp.ne.s32.totalorder %s1843_s24, %s1415_s26  ;;  %p2064_p11 = scmp.ne.s32.totalorder %s2058_s3, 0 }
  0x90   : > { %s1420_s16 = scalar_lea.hbm %s1999_s0, 256  ;;  %p1421_p1 = scmp.lt.u32.totalorder %s1843_s24, %s1999_s0 }
  0x91   : > { %p1418_p3 = pnand %p1416_p7, %p2064_p11  ;;  %p1422_p10 = scmp.lt.u32.totalorder %s1420_s16, %s1415_s26 }
  0x92   : > { %p1424_p8 = scmp.lt.u32.totalorder %s1415_s26, %s1843_s24 }
  0x93   : > { %p1419_p13 = pneg %p1418_p3  ;;  %p1423_p6 = por %p1422_p10, %p1421_p1 }
  0x95   : > { %p1425_p12 = por %p1424_p8, %p1423_p6 }
  0x97   : > { %p1426_p0 = pnand %p1425_p12, %p1419_p13 }
  0x99   : > { %1429 = shalt.err (!%p1426_p0)
}
  0x9a   : > { %s1430_s28 = scalar_lea.vmem %s355_s9, 128  ;;  %s1577_s6 = smov [#allocation4]  }
  0x9b   : > { %p1431_p5 = scmp.ne.s32.totalorder %s355_s9, %s1430_s28  ;;  %s1435_s8 = sshll.u32 %s1577_s6, 4  ;;  %s1436_s8 = int_to_ptr.vmem [resolvable:$false] %s1435_s8 }
  0x9c   : > { %s1437_s12 = scalar_lea.vmem %s1436_s8, 256  ;;  %p1438_p4 = scmp.lt.s32.totalorder %s355_s9, %s1436_s8 }
  0x9d   : > { %p1433_p9 = pnand %p1431_p5, %p2064_p11  ;;  %p1439_p7 = scmp.lt.s32.totalorder %s1437_s12, %s1430_s28 }
  0x9f   : > { %p1434_p2 = pneg %p1433_p9  ;;  %p1440_p3 = por %p1439_p7, %p1438_p4 }
  0xa1   : > { %p1441_p1 = pnand %p1440_p3, %p1434_p2 }
  0xa3   : > { %1444 = shalt.err (!%p1441_p1)
}
  0xa4   : > { %p2065_p10 = scmp.ne.s32.totalorder %s2056_s25, 0  ;;  %s1869_s14 = scalar_lea.hbm %s2001_s2, %s1745_s27 }
  0xa5   : > { %s383_s26 = scalar_lea.vmem [#allocation9], %s1742_s21  ;;  %s1445_s13 = scalar_lea.hbm %s1869_s14, 128 }
  0xa6   : > { %1222 = dma.hbm_to_vmem [thread:$0]  (!%p2065_p10), %s1843_s24, 128, %s355_s9, %s343_s23  }
  0xa7   : > { %s390_s1 = sshll.u32 %s383_s26, 4  ;;  %p1446_p13 = scmp.ne.s32.totalorder %s1869_s14, %s1445_s13  ;;  %s391_s1 = int_to_ptr.vmem [resolvable:$true] %s390_s1 }
  0xa8   : > { %s1450_s24 = scalar_lea.hbm %s2001_s2, 256  ;;  %p1451_p12 = scmp.lt.u32.totalorder %s1869_s14, %s2001_s2 }
  0xa9   : > { %p1448_p6 = pnand %p1446_p13, %p2064_p11  ;;  %p1452_p0 = scmp.lt.u32.totalorder %s1450_s24, %s1445_s13 }
  0xaa   : > { %p1454_p9 = scmp.lt.u32.totalorder %s1445_s13, %s1869_s14 }
  0xab   : > { %p1449_p8 = pneg %p1448_p6  ;;  %p1453_p5 = por %p1452_p0, %p1451_p12 }
  0xad   : > { %p1455_p2 = por %p1454_p9, %p1453_p5 }
  0xaf   : > { %p1456_p4 = pnand %p1455_p2, %p1449_p8 }
  0xb1   : > { %1459 = shalt.err (!%p1456_p4)
}
  0xb2   : > { %s1460_s21 = scalar_lea.vmem %s391_s1, 128  ;;  %s1578_s27 = smov [#allocation9]  }
  0xb3   : > { %p1461_p7 = scmp.ne.s32.totalorder %s391_s1, %s1460_s21  ;;  %s1465_s20 = sshll.u32 %s1578_s27, 4  ;;  %s1466_s20 = int_to_ptr.vmem [resolvable:$false] %s1465_s20 }
  0xb4   : > { %s1467_s28 = scalar_lea.vmem %s1466_s20, 256  ;;  %p1468_p13 = scmp.lt.s32.totalorder %s391_s1, %s1466_s20 }
  0xb5   : > { %p1463_p3 = pnand %p1461_p7, %p2064_p11  ;;  %p1469_p6 = scmp.lt.s32.totalorder %s1467_s28, %s1460_s21 }
  0xb7   : > { %p1464_p1 = pneg %p1463_p3  ;;  %p1470_p10 = por %p1469_p6, %p1468_p13 }
  0xb9   : > { %p1471_p0 = pnand %p1470_p10, %p1464_p1 }
  0xbb   : > { %1474 = shalt.err (!%p1471_p0)
}
  0xbc   : > { %p2066_p12 = scmp.ne.s32.totalorder %s2056_s25, 0  ;;  %p2067_p8 = scmp.ne.s32.totalorder %s2047_s19, 0 }
  0xbd   : > { %s1893_s3 = sand.u32 (!%p2067_p8), 1, %s1553_s10   ;;  %p2068_p11 = scmp.ne.s32.totalorder (!%p2067_p8), %s2044_s17, 0 }
  0xbe   : > { %1228 = dma.hbm_to_vmem [thread:$0]  (!%p2066_p12), %s1869_s14, 128, %s391_s1, %s1766_s30  }
  0xbf   : > { %399 = sbr.rel (%p2067_p8) target bundleno = 1045 (0x415), region = 56  ;;  %s1896_s6 = sshll.u32 (!%p2067_p8), %s1893_s3, 3 }
  0xc0   : > { %s402_s8 = scalar_lea.sflag (!%p2067_p8), [#allocation5], %s1893_s3  ;;  %s405_s12 = scalar_lea.vmem (!%p2067_p8), [#allocation4], %s1896_s6 }
  0xc6   : > { %1528 = dma.done.wait (%p2068_p11), %s402_s8, 128  }
  0xc7   : > { %1530 = vsyncadd (%p2068_p11), %s402_s8, 4294967168  ;;  %s410_s30 = sand.u32 1, %s1664_s15   ;;  %s414_s25 = scalar_lea.vmem [#allocation7], %s1896_s6 }
  0xc8   : > { %s411_s19 = scalar_lea.sflag [#allocation8], %s410_s30 }
  0xc9   : > { %1532 = dma.done.wait (%p2068_p11), %s411_s19, 256  }
  0xca   : > { %1534 = vsyncadd (%p2068_p11), %s411_s19, 4294967040  ;;  %s423_s29 = scalar_lea.vmem [#allocation9], %s1896_s6  ;;  %p2069_p10 = scmp.eq.s32.totalorder %s1664_s15, 0 }
  0xcc   : > { %1536 = dma.done.wait (%p2069_p10), [#allocation11], 1024   ;;  %p2070_p5 = pmov %p2069_p10 }
  0xce   : > { %1538 = vsyncadd (%p2070_p5), [#allocation11], 4294966272  ;;  %p2071_p9 = pmov %p2070_p5 }
  0xcf   : > { %p2072_p2 = pmov %p2070_p5 }
  0xd0   : > { %1540 = dma.done.wait (%p2071_p9), [#allocation14], 512  }
  0xd1   : > { %1542 = vsyncadd (%p2072_p2), [#allocation14], 4294966784  ;;  %v1579_v0 = vmov 0.0|0.0   ;;  %vm1580_vm0 = vmmov 0   ;;  %v1581_v1 = vmov 0.0   ;;  %v485_v2 = vld [vmem:[#allocation12] sm:$0xff] }
  0xd2   : > { %1171 = vmatprep.subr.bf16.mxu0 %v1579_v0  ;;  %1136 = vmatprep.mubr.msk.f32.mxu0 %vm1580_vm0, %v1581_v1  ;;  %v486_v3 = vld [vmem:[#allocation12 + $0x8] sm:$0xff]  ;;  %v487_v4 = vld [vmem:[#allocation12 + $0x10] sm:$0xff]  ;;  %v488_v6 = vld [vmem:[#allocation12 + $0x18] sm:$0xff]  ;;  %vm496_vm1 = vcmask 261120   ;;  %s2073_s26 = sld [smem:[#allocation31_spill]]  ;;  %s2074_s16 = sld [smem:[#allocation32_spill]] }
  0xd3   : > { %1177 = vmatprep.subr.bf16.mxu1 %v1579_v0  ;;  %1147 = vmatprep.mubr.msk.f32.mxu1 %vm1580_vm0, %v1581_v1  ;;  %v1172_v5 = vpack.c.bf16 %v486_v3, %v485_v2  ;;  %v1175_v7 = vpack.c.bf16 %v488_v6, %v487_v4  ;;  %v572_v8 = vld [vmem:[#allocation13] sm:$0xff]  ;;  %v573_v9 = vld [vmem:[#allocation13 + $0x8] sm:$0xff]  ;;  %v660_v15 = vld [vmem:[#allocation10 + $0x10] sm:$0xff]  ;;  %s2075_s18 = sld [smem:[#allocation22_spill]]  ;;  %vm821_vm2 = vcmask 64512   ;;  %s2076_s24 = sld [smem:[#allocation27_spill]] }
  0xd4   : > { %v658_v10 = vld [vmem:[#allocation10] sm:$0xff]  ;;  %v659_v11 = vld [vmem:[#allocation10 + $0x8] sm:$0xff]  ;;  %v1178_v12 = vpack.c.bf16 %v573_v9, %v572_v8  ;;  %v661_v16 = vld [vmem:[#allocation10 + $0x18] sm:$0xff]  ;;  %s479_s23 = scalar_lea.vmem [#allocation15], %s1896_s6  ;;  %s2077_s28 = sld [smem:[#allocation33_spill]] }
  0xd5   : > { %1173 = vmatpush3.bf16.msra.mxu0 %v1172_v5  ;;  %v484_v13 = vld [vmem:[%s414_s25] sm:$0xff]  ;;  %v1184_v14 = vpack.c.bf16 %v659_v11, %v658_v10  ;;  %v1187_v17 = vpack.c.bf16 %v661_v16, %v660_v15  ;;  %v657_v18 = vld [vmem:[%s405_s12] sm:$0xff]  ;;  %s923_s21 = sshll.u32 %s479_s23, 4  ;;  %s909_s12 = scalar_lea.sflag [#allocation6], %s1893_s3  ;;  %s1951_s21 = int_to_ptr.vmem [resolvable:$true] %s923_s21 }
  0xd6   : > { %1174 = vmatprep.subr.bf16.mxu0 %v1579_v0  ;;  %1179 = vmatpush3.bf16.msra.mxu1 %v1178_v12  ;;  %v574_v19 = vld [vmem:[#allocation13 + $0x10] sm:$0xff]  ;;  %v575_v20 = vld [vmem:[#allocation13 + $0x18] sm:$0xff]  ;;  %v1096_v23 = vld [vmem:[%s2006_s7] ss:$0 sm:$0xff]  ;;  %s1475_s30 = scalar_lea.vmem %s1951_s21, 128  ;;  %s1582_s6 = smov [#allocation15]  }
  0xd7   : > { %1180 = vmatprep.subr.bf16.mxu1 %v1579_v0  ;;  %v1181_v21 = vpack.c.bf16 %v575_v20, %v574_v19  ;;  %v571_v22 = vld [vmem:[%s423_s29] sm:$0xff]  ;;  %p1476_p4 = scmp.ne.s32.totalorder %s1951_s21, %s1475_s30  ;;  %s1479_s19 = sshll.u32 %s1582_s6, 4  ;;  %s1480_s19 = int_to_ptr.vmem [resolvable:$false] %s1479_s19 }
  0xd8   : > { %v1100_v27 = vld [vmem:[%s2073_s26] ss:$0 sm:$0xff]  ;;  %s1481_s25 = scalar_lea.vmem %s1480_s19, 256  ;;  %p1482_p13 = scmp.lt.s32.totalorder %s1951_s21, %s1480_s19 }
  0xd9   : > { %1176 = vmatpush3.bf16.msra.mxu0 %v1175_v7  ;;  %v1098_v32 = vld [vmem:[%s2074_s16] ss:$0 sm:$0xff]  ;;  %s1106_s9 = sshll.u32 %s2075_s18, 7  ;;  %p2078_p7 = scmp.ne.s32.totalorder %s2076_s24, 0 }
  0xda   : > { %1183 = vmatprep.subr.bf16.mxu0 %v1579_v0  ;;  %1182 = vmatpush3.bf16.msra.mxu1 %v1181_v21  ;;  %s1949_s8 = scalar_lea.hbm %s2077_s28, %s1106_s9  ;;  %p1483_p6 = scmp.lt.s32.totalorder %s1481_s25, %s1475_s30 }
  0xdb   : > { %1161 = vmatprep.subr.mxu1 %v1581_v1  ;;  %p1477_p3 = pnand %p1476_p4, %p2078_p7 }
  0xdc   : > { %1137 = vmatmul.mubr.msk.f32.vlgmr.msra.gmra.mrb[0].mxu0 %vm496_vm1, %v484_v13  ;;  %p1484_p0 = por %p1483_p6, %p1482_p13 }
  0xdd   : > { %1185 = vmatpush3.bf16.msra.mxu0 %v1184_v14  ;;  %1158 = vmatprep.mubr.msk.f32.mxu0 %vm1580_vm0, %v1581_v1  ;;  %p1478_p1 = pneg %p1477_p3 }
  0xde   : > { %1186 = vmatprep.subr.bf16.mxu0 %v1579_v0  ;;  %1148 = vmatmul.mubr.msk.f32.vlgmr.msra.gmra.mrb[0].mxu1 %vm496_vm1, %v571_v22 }
  0xdf   : > { %1163 = vmatprep.mubr.msk.f32.mxu1 %vm1580_vm0, %v1581_v1  ;;  %p1485_p12 = pnand %p1484_p0, %p1478_p1 }
  0xe1   : > { %1188 = vmatpush3.bf16.msra.mxu0 %v1187_v17 }
  0xe4   : > { %1159 = vmatmul.mubr.msk.f32.vlgmr.msra.gmra.mrb[2].mxu0 %vm496_vm1, %v657_v18 }
 0x1af   : > { %v566_v24 = vpop.f32.mrb[0].mxu0 }
 0x1b0   : > { %v567_v25 = vadd.f32 %v1096_v23, %v566_v24  ;;  %v1138_v26 = vpop.f32.mrb[1].mxu0 }
 0x1b1   : > { %v652_v33 = vpop.f32.mrb[0].mxu1 }
 0x1b2   : > { %570 = vst.msk [vmem:[#allocation2] sm:$0xff] %vm496_vm1, %v567_v25  ;;  %v653_v34 = vadd.f32 %v1098_v32, %v652_v33  ;;  %v1149_v35 = vpop.f32.mrb[1].mxu1 }
 0x1b4   : > { %656 = vst.msk [vmem:[#allocation3] sm:$0xff] %vm496_vm1, %v653_v34 }
 0x1b7   : > { %v739_v28 = vpop.f32.mrb[2].mxu0 }
 0x1b8   : > { %v1160_v29 = vpop.f32.mrb[3].mxu0  ;;  %v740_v30 = vadd.f32 %v1100_v27, %v739_v28 }
 0x1b9   : > { %v743_v31 = vld [vmem:[#allocation2] sm:$0xff] }
 0x1ba   : > { %1162 = vmatpush3.xpose.msk.msra.mxu1 %vm496_vm1, %v743_v31 }
 0x1bb   : > { %1166 = vmatprep.subr.mxu1 %v1581_v1  ;;  %v831_v36 = vld [vmem:[#allocation3] sm:$0xff] }
 0x1bd   : > { %1164 = vmatmul.mubr.msk.f32.vlgmr.msra.gmra.mrb[2].mxu1 %vm496_vm1, %v740_v30 }
 0x1be   : > { %1168 = vmatprep.mubr.msk.f32.mxu1 %vm1580_vm0, %v1581_v1  ;;  %1167 = vmatpush3.msra.mxu1 %v831_v36 }
 0x290   : > { %v816_v37 = vpop.f32.mrb[2].mxu1 }
 0x291   : > { %v820_v38 = vmul.f32 0.17677669, %v816_v37  ;;  %v1165_v39 = vpop.f32.mrb[3].mxu1 }
 0x293   : > { %v822_v40 = vsel %vm821_vm2, %v820_v38, -inf }
 0x294   : > { %823 = vmax.xlane.f32.xlu0 %v822_v40 }
 0x321   : > { %v824_v41 = vpop.xlane.xlu0 %823 }
 0x322   : > { %v825_v42 = vsub.f32 %v820_v38, %v824_v41 }
 0x324   : > { %v826_v43 = vmul.f32 1.442695, %v825_v42 }
 0x326   : > { %1297 = vpow2.f32 %v826_v43 }
 0x330   : > { %v1298_v44 = vpop.eup %1297 }
 0x331   : > { %1169 = vmatmul.mubr.msk.f32.vlgmr.msra.gmra.mrb[4].mxu1 %vm821_vm2, %v1298_v44  ;;  %v828_v45 = vsel %vm821_vm2, %v1298_v44, 0.0 }
 0x332   : > { %829 = vadd.xlane.f32.xlu0 %v828_v45 }
 0x3bf   : > { %v830_v46 = vpop.xlane.xlu0 %829 }
 0x3c0   : > { %1299 = vrcp.f32 %v830_v46 }
 0x3ca   : > { %v1300_v47 = vpop.eup %1299 }
 0x404   : > { %v901_v48 = vpop.f32.mrb[4].mxu1 }
 0x405   : > { %v906_v49 = vmul.f32 %v1300_v47, %v901_v48  ;;  %v1170_v50 = vpop.f32.mrb[5].mxu1 }
 0x407   : > { %907 = vst.msk [vmem:[%s479_s23] sm:$0xff] %vm496_vm1, %v906_v49 }
 0x408   : > { %1488 = shalt.err (!%p1485_p12)
}
 0x409   : > { %s1489_s3 = scalar_lea.hbm %s1949_s8, 128  ;;  %s1493_s17 = scalar_lea.hbm %s2077_s28, 256 }
 0x40a   : > { %p1490_p8 = scmp.ne.s32.totalorder %s1949_s8, %s1489_s3  ;;  %p1494_p5 = scmp.lt.u32.totalorder %s1949_s8, %s2077_s28 }
 0x40b   : > { %p1495_p9 = scmp.lt.u32.totalorder %s1493_s17, %s1489_s3  ;;  %p1497_p4 = scmp.lt.u32.totalorder %s1489_s3, %s1949_s8 }
 0x40c   : > { %p1491_p11 = pnand %p1490_p8, %p2078_p7 }
 0x40d   : > { %p1496_p2 = por %p1495_p9, %p1494_p5 }
 0x40e   : > { %p1492_p10 = pneg %p1491_p11 }
 0x40f   : > { %p1498_p3 = por %p1497_p4, %p1496_p2 }
 0x411   : > { %p1499_p1 = pnand %p1498_p3, %p1492_p10 }
 0x413   : > { %1502 = shalt.err (!%p1499_p1)
}
 0x414   : > { %1207 = dma.vmem_to_hbm [thread:$0]  (%p2078_p7), %s1951_s21, 128, %s1949_s8, %s909_s12  }
 0x415 PF: > { %s2079_s26 = sld [smem:[#allocation21_spill]]  ;;  %s2080_s1 = sld [smem:[#allocation25_spill]] }
 0x416   : > { %s2081_s13 = sld [smem:[#allocation24_spill]] }
 0x41b   : > { %s935_s16 = sand.u32 1, %s2079_s26   ;;  %p2082_p13 = scmp.ne.s32.totalorder %s2080_s1, 0 }
 0x41c   : > { %p2083_p6 = scmp.ge.s32.totalorder %s2081_s13, 2  ;;  %s936_s18 = scalar_lea.sflag [#allocation6], %s935_s16 }
 0x41e   : > { %p1230_p0 = pnand %p2083_p6, %p2082_p13 }
 0x420   : > { %1544 = dma.done.wait (!%p1230_p0), %s936_s18, 128  }
 0x421   : > { %1546 = vsyncadd (!%p1230_p0), %s936_s18, 4294967168  ;;  %s30_s14 = sadd.s32 1, %s2081_s13   ;;  %s2084_s24 = sld [smem:[#allocation28_spill]] }
 0x422   : > { %p27_p12 = scmp.ge.s32.totalorder %s30_s14, 4   ;;  %s2085_s12 = sld [smem:[#allocation23_spill]] }
 0x423   : > { %s2086_s13 = sld [smem:[#allocation26_spill]]  ;;  %s2087_s30 = smov %s1553_s10 }
 0x424   : > { %s2088_s10 = smov %s1557_s11  ;;  %29 = sbr.rel (!%p27_p12) target bundleno = 16 (0x10), region = 141 }
 0x427   : > { %s2089_s11 = smov %s2084_s24 }
 0x42b   :  { %941 = vsyncpa [#allocation5], 1 }
 0x42c   :  { %943 = vsyncpa [#allocation5 + $0x1], 1 }
 0x42d   :  { %944 = vsyncpa [#allocation8], 1 }
 0x42e   :  { %946 = vsyncpa [#allocation8 + $0x1], 1 }
 0x42f   :  { %947 = vsyncpa [#allocation11], 1 }
 0x430   :  { %948 = vsyncpa [#allocation14], 1 }
 0x431   :  { %949 = vsyncpa [#allocation6], 1 }
 0x432   :  { %951 = vsyncpa [#allocation6 + $0x1], 1 }

</bundles_post_ra>
